<compile_context>
chip_gen: v6e
topology: v6e:2x2x1
jax: 0.10.0
libtpu: 0.0.40
codegen_flags: <defaults>
</compile_context>

<pallas_src>
import math
import functools

import jax
import jax.numpy as jnp
from jax import lax
from jax.experimental import pallas as pl
from jax.experimental.pallas import tpu as pltpu

LN_EPS = 1e-5                       # torch nn.LayerNorm default
VMEM_LIMIT = 48 * 1024 * 1024       # leave headroom on v7x (64 MiB physical/TC)


def _round_up(a, b):
    return ((a + b - 1) // b) * b


def _default_tm():
    # 256-row LHS tiles for the 256-wide MXU on v6e/v7x; 128 on earlier gens.
    try:
        kind = jax.devices()[0].device_kind.lower()
    except Exception:
        return 256
    if any(t in kind for t in ("v2", "v3", "v4", "v5")):
        return 128
    return 256


def _row_tile(M, tm):
    # Largest row tile <= min(M, tm) that keeps the (8, 128) block rule happy.
    # Partial tail blocks are masked by Pallas, so no host-side pad/slice copies.
    if M <= tm:
        return M if M < 8 else (M // 8) * 8
    return tm


# ----------------------------- helpers (traced inside kernels) ---------------
def _layernorm(x, g, b):
    mu = jnp.mean(x, axis=-1, keepdims=True)
    var = jnp.mean((x - mu) ** 2, axis=-1, keepdims=True)
    return (x - mu) * lax.rsqrt(var + LN_EPS) * g + b


def _erf(x):
    # Abramowitz & Stegun 7.1.26 polynomial erf (|err| < 1.5e-7): matches
    # torch's exact (erf-based) nn.GELU to f32 precision using VPU + EUP exp.
    a1, a2, a3, a4, a5 = 0.254829592, -0.284496736, 1.421413741, -1.453152027, 1.061405429
    p = 0.3275911
    s = jnp.where(x >= 0.0, 1.0, -1.0)
    ax = jnp.abs(x)
    t = 1.0 / (1.0 + p * ax)
    poly = ((((a5 * t + a4) * t + a3) * t + a2) * t + a1) * t
    return s * (1.0 - poly * jnp.exp(-ax * ax))


# ----------------------------- kernel 1: LayerNorm + qkv projection ----------
def ln_linear_kernel(x_ref, g_ref, be_ref, w_ref, o_ref):
    x = x_ref[...].astype(jnp.float32)
    xn = _layernorm(x, g_ref[...].astype(jnp.float32), be_ref[...].astype(jnp.float32))
    y = jnp.dot(xn.astype(w_ref.dtype), w_ref[...],
                preferred_element_type=jnp.float32)          # qkv_bias=False
    o_ref[...] = y.astype(o_ref.dtype)


def ln_linear(x2d, gamma, beta, w, *, tm=None, out_dtype=None):
    M, C = x2d.shape
    O = w.shape[1]
    out_dtype = out_dtype or x2d.dtype
    tm = tm or _default_tm()
    tm_eff = _row_tile(M, tm)
    return pl.pallas_call(
        ln_linear_kernel,
        out_shape=jax.ShapeDtypeStruct((M, O), out_dtype),
        grid=(pl.cdiv(M, tm_eff),),
        in_specs=[
            pl.BlockSpec((tm_eff, C), lambda i: (i, 0)),
            pl.BlockSpec((1, C), lambda i: (0, 0)),
            pl.BlockSpec((1, C), lambda i: (0, 0)),
            pl.BlockSpec((C, O), lambda i: (0, 0)),
        ],
        out_specs=pl.BlockSpec((tm_eff, O), lambda i: (i, 0)),
        compiler_params=pltpu.CompilerParams(
            dimension_semantics=("parallel",), vmem_limit_bytes=VMEM_LIMIT),
    )(x2d, gamma, beta, w)


# ----------------------------- kernel 2: attention + proj + residual ----------
# Grid = (batch, q-blocks).  Each step: all heads for one (tq, C) query slab,
# per-head result written into a bf16 VMEM scratch slice, then the fused output
# projection + bias + residual add, stored lane-dense into (B, N, C).
def attn_proj_kernel(qkv_q_ref, qkv_kv_ref, slog_ref, wp_ref, bp_ref, res_ref,
                     o_ref, acc_ref, *, num_heads, head_dim, scale):
    C = num_heads * head_dim
    slog = slog_ref[0].astype(jnp.float32)                           # (1, N)
    for h in range(num_heads):                                       # static unroll
        q = qkv_q_ref[0, :, pl.ds(h * head_dim, head_dim)]           # (tq, Dh) bf16
        k = qkv_kv_ref[0, :, pl.ds(C + h * head_dim, head_dim)]      # (N, Dh) bf16
        v = qkv_kv_ref[0, :, pl.ds(2 * C + h * head_dim, head_dim)]  # (N, Dh) bf16
        # bf16 MXU operands, f32 accumulate; no explicit transpose (contract last dims)
        s = lax.dot_general(q, k, (((1,), (1,)), ((), ())),
                            preferred_element_type=jnp.float32)      # (tq, N)
        s = s * scale + slog                                         # + log(size) over keys
        s = s - jnp.max(s, axis=-1, keepdims=True)
        p = jnp.exp(s)
        p = p * pl.reciprocal(jnp.sum(p, axis=-1, keepdims=True), approx=True)
        o_h = jnp.dot(p.astype(v.dtype), v, preferred_element_type=jnp.float32)
        acc_ref[:, pl.ds(h * head_dim, head_dim)] = o_h.astype(acc_ref.dtype)
    # fused output projection + bias + residual
    y = jnp.dot(acc_ref[...], wp_ref[...], preferred_element_type=jnp.float32)
    y = y + bp_ref[...].astype(jnp.float32) + res_ref[0].astype(jnp.float32)
    o_ref[...] = y[None].astype(o_ref.dtype)


def attention_proj_residual(qkv, size_log, w_proj, b_proj, x_res, num_heads, *, tq=128):
    # TODO(synk): for long sequences tile the KV axis flash-style (online softmax)
    # instead of keeping the full (N, 3C) slab + per-head (tq, N) scores resident.
    B, N, threeC = qkv.shape
    C = threeC // 3
    Dh = C // num_heads
    tq_eff = _row_tile(N, tq)
    kernel = functools.partial(attn_proj_kernel, num_heads=num_heads,
                               head_dim=Dh, scale=Dh ** -0.5)
    return pl.pallas_call(
        kernel,
        out_shape=jax.ShapeDtypeStruct((B, N, C), x_res.dtype),
        grid=(B, pl.cdiv(N, tq_eff)),
        in_specs=[
            pl.BlockSpec((1, tq_eff, threeC), lambda b, qi: (b, qi, 0)),  # query tile
            pl.BlockSpec((1, N, threeC), lambda b, qi: (b, 0, 0)),        # full K/V slab
            pl.BlockSpec((1, 1, N), lambda b, qi: (b, 0, 0)),             # log(size) bias
            pl.BlockSpec((C, C), lambda b, qi: (0, 0)),                   # w_proj
            pl.BlockSpec((1, C), lambda b, qi: (0, 0)),                   # b_proj
            pl.BlockSpec((1, tq_eff, C), lambda b, qi: (b, qi, 0)),       # residual x
        ],
        out_specs=pl.BlockSpec((1, tq_eff, C), lambda b, qi: (b, qi, 0)),
        scratch_shapes=[pltpu.VMEM((tq_eff, C), jnp.bfloat16)],
        compiler_params=pltpu.CompilerParams(
            dimension_semantics=("parallel", "parallel"),
            vmem_limit_bytes=VMEM_LIMIT),
    )(qkv, qkv, size_log, w_proj, b_proj, x_res)


# ----------------------------- kernel 3: fused merge-score metric -------------
# metric = k.mean(heads), normalized; even/odd cosine similarity; row 0 -> -inf;
# emits only the per-row max and argmax (no (N/2, N/2) or (N, Dh) HBM traffic).
def merge_scores_kernel(qkv_ref, nmax_ref, nidx_ref, m_ref, *, num_heads, head_dim):
    C = num_heads * head_dim
    N = qkv_ref.shape[1]
    nh = N // 2
    ks = qkv_ref[0, :, pl.ds(C, head_dim)].astype(jnp.float32)
    for h in range(1, num_heads):
        ks = ks + qkv_ref[0, :, pl.ds(C + h * head_dim, head_dim)].astype(jnp.float32)
    m = ks * (1.0 / num_heads)                                        # k.mean over heads
    m = m * lax.rsqrt(jnp.sum(m * m, axis=-1, keepdims=True) + 1e-12)
    m_ref[...] = m
    a = m_ref[pl.ds(0, nh, stride=2), :].astype(jnp.bfloat16)         # even tokens
    b = m_ref[pl.ds(1, nh, stride=2), :].astype(jnp.bfloat16)         # odd tokens
    s = lax.dot_general(a, b, (((1,), (1,)), ((), ())),
                        preferred_element_type=jnp.float32)           # (nh, nh)
    row = lax.broadcasted_iota(jnp.int32, s.shape, 0)
    s = jnp.where(row == 0, -jnp.inf, s)                              # scores[..., 0, :] = -inf
    nmax = jnp.max(s, axis=-1, keepdims=True)                         # (nh, 1)
    col = lax.broadcasted_iota(jnp.int32, s.shape, 1)
    nidx = jnp.min(jnp.where(s == nmax, col, jnp.int32(nh)),
                   axis=-1, keepdims=True)                            # first argmax
    nmax_ref[...] = nmax[None]
    nidx_ref[...] = nidx[None]


def merge_scores(qkv, num_heads):
    B, N, threeC = qkv.shape
    C = threeC // 3
    Dh = C // num_heads
    nh = N // 2
    kernel = functools.partial(merge_scores_kernel, num_heads=num_heads, head_dim=Dh)
    nmax, nidx = pl.pallas_call(
        kernel,
        out_shape=(jax.ShapeDtypeStruct((B, nh, 1), jnp.float32),
                   jax.ShapeDtypeStruct((B, nh, 1), jnp.int32)),
        grid=(B,),
        in_specs=[pl.BlockSpec((1, N, threeC), lambda b: (b, 0, 0))],
        out_specs=(pl.BlockSpec((1, nh, 1), lambda b: (b, 0, 0)),
                   pl.BlockSpec((1, nh, 1), lambda b: (b, 0, 0))),
        scratch_shapes=[pltpu.VMEM((N, Dh), jnp.float32)],
        compiler_params=pltpu.CompilerParams(
            dimension_semantics=("parallel",), vmem_limit_bytes=VMEM_LIMIT),
    )(qkv)
    return nmax[..., 0], nidx[..., 0]


# ----------------------------- kernel 4: norm2 + MLP + residual ---------------
def mlp_kernel(x_ref, g_ref, be_ref, w1_ref, b1_ref, w2_ref, b2_ref, o_ref):
    x = x_ref[...].astype(jnp.float32)
    xn = _layernorm(x, g_ref[...].astype(jnp.float32), be_ref[...].astype(jnp.float32))
    h = jnp.dot(xn.astype(w1_ref.dtype), w1_ref[...],
                preferred_element_type=jnp.float32) + b1_ref[...].astype(jnp.float32)
    # exact (erf-based) GELU like torch nn.GELU; EUP exp + VPU polynomial.
    # TODO(synk): a tanh-approx GELU would offload more work to the EUP slot on v6e/v7x.
    h = 0.5 * h * (1.0 + _erf(h * (1.0 / math.sqrt(2.0))))
    y = jnp.dot(h.astype(w2_ref.dtype), w2_ref[...],
                preferred_element_type=jnp.float32) + b2_ref[...].astype(jnp.float32)
    o_ref[...] = (x + y).astype(o_ref.dtype)


def mlp_block(x2d, gamma, beta, w1, b1, w2, b2, *, tm=None, out_dtype=None):
    # TODO(synk): for very large C*hidden on v7x (64 MiB VMEM) tile the hidden dim
    # with an "arbitrary" reduction grid axis + f32 accumulator; bf16 weights and
    # the 48 MiB vmem limit keep the fully-fused version in budget at these sizes.
    M, C = x2d.shape
    Hd = w1.shape[1]
    out_dtype = out_dtype or x2d.dtype
    tm = tm or _default_tm()
    tm_eff = _row_tile(M, tm)
    return pl.pallas_call(
        mlp_kernel,
        out_shape=jax.ShapeDtypeStruct((M, C), out_dtype),
        grid=(pl.cdiv(M, tm_eff),),
        in_specs=[
            pl.BlockSpec((tm_eff, C), lambda i: (i, 0)),
            pl.BlockSpec((1, C), lambda i: (0, 0)),
            pl.BlockSpec((1, C), lambda i: (0, 0)),
            pl.BlockSpec((C, Hd), lambda i: (0, 0)),
            pl.BlockSpec((1, Hd), lambda i: (0, 0)),
            pl.BlockSpec((Hd, C), lambda i: (0, 0)),
            pl.BlockSpec((1, C), lambda i: (0, 0)),
        ],
        out_specs=pl.BlockSpec((tm_eff, C), lambda i: (i, 0)),
        compiler_params=pltpu.CompilerParams(
            dimension_semantics=("parallel",), vmem_limit_bytes=VMEM_LIMIT),
    )(x2d, gamma, beta, w1, b1, w2, b2)


# ----------------------------- full block forward ------------------------------
def inference_ltm_block(x, params, num_heads, size=None, threshold=1.0):
    B, N, C = x.shape
    if size is None:
        size = jnp.ones((B, N, 1), jnp.float32)

    # --- norm1 -> fused qkv projection (no bias: qkv_bias=False) ---
    x2d = x.reshape(B * N, C)
    qkv = ln_linear(x2d, params["ln1_g"], params["ln1_b"], params["w_qkv"],
                    out_dtype=params["w_qkv"].dtype).reshape(B, N, 3 * C)   # bf16

    # --- attention (+ log(size) bias) fused with output proj + residual ---
    size_log = jnp.log(size[..., 0])[:, None, :].astype(jnp.float32)        # (B, 1, N)
    x = attention_proj_residual(qkv, size_log, params["w_proj"],
                                params["b_proj"], x, num_heads)             # (B, N, C)

    # --- token merging: fused metric / cosine similarity / max / argmax ---
    node_max, node_idx = merge_scores(qkv, num_heads)                       # (B, N/2) each
    # InferenceThresholdMasker with threshold initialized to 1 (cosine <= 1 -> ~all False)
    merge_mask = node_max >= threshold

    # The torch merge path flattens the batch with boolean masks -> only B == 1 is valid there.
    assert B == 1, "merge path (like the torch reference) only supports batch=1"
    n_half = N // 2
    x = x * size
    src_x, dst_x = x[:, 0::2, :], x[:, 1::2, :]
    src_s, dst_s = size[:, 0::2, :], size[:, 1::2, :]

    unm_mask = jnp.logical_not(merge_mask[0])
    # TODO(synk): torch's output token count is data-dependent (sum of unm_mask); JAX needs
    # static shapes, so the unmerged segment keeps the static upper bound N//2 (exact whenever
    # no tokens merge, which is the case for threshold=1 with non-duplicate tokens).
    unm_idx = jnp.nonzero(unm_mask, size=n_half, fill_value=0)[0]
    unm_x = src_x[0][unm_idx][None]
    unm_s = src_s[0][unm_idx][None]

    merge_idx = jnp.nonzero(merge_mask[0], size=n_half, fill_value=0)[0]
    mw = merge_mask[0][merge_idx].astype(x.dtype)[:, None]        # zero-out padded entries
    dst_idx = node_idx[0][merge_idx]
    dst_x = dst_x[0].at[dst_idx].add(mw * src_x[0][merge_idx])[None]  # scatter_reduce('sum')
    dst_s = dst_s[0].at[dst_idx].add(mw * src_s[0][merge_idx])[None]

    x = jnp.concatenate([unm_x, dst_x], axis=1)
    size = jnp.concatenate([unm_s, dst_s], axis=1)
    x = x / size

    # --- norm2 -> fc1 -> GELU -> fc2 -> residual ---
    B2, N2, _ = x.shape
    x = mlp_block(x.reshape(B2 * N2, C), params["ln2_g"], params["ln2_b"],
                  params["w1"], params["b1"], params["w2"], params["b2"],
                  out_dtype=x.dtype).reshape(B2, N2, C)
    return x, size


# ----------------------------- deterministic parameter init --------------------
def init_params(key, dim, num_heads, mlp_ratio=4.0):
    hidden = int(dim * mlp_ratio)
    ks = jax.random.split(key, 8)
    s = 0.02
    wdt = jnp.bfloat16       # weights in bf16 (MXU operands); biases/LN params f32
    return dict(
        ln1_g=jnp.ones((1, dim), jnp.float32),
        ln1_b=jnp.zeros((1, dim), jnp.float32),
        w_qkv=(jax.random.normal(ks[0], (dim, 3 * dim)) * s).astype(wdt),
        w_proj=(jax.random.normal(ks[1], (dim, dim)) * s).astype(wdt),
        b_proj=(jax.random.normal(ks[2], (1, dim)) * s).astype(jnp.float32),
        ln2_g=jnp.ones((1, dim), jnp.float32),
        ln2_b=jnp.zeros((1, dim), jnp.float32),
        w1=(jax.random.normal(ks[3], (dim, hidden)) * s).astype(wdt),
        b1=(jax.random.normal(ks[4], (1, hidden)) * s).astype(jnp.float32),
        w2=(jax.random.normal(ks[5], (hidden, dim)) * s).astype(wdt),
        b2=(jax.random.normal(ks[6], (1, dim)) * s).astype(jnp.float32),
    )


if __name__ == "__main__":
    key = jax.random.PRNGKey(0)
    kx, kp = jax.random.split(key)
    B, N, C, H = 1, 8, 32, 4          # dim=32, num_heads=4, head_dim=8, mlp hidden=128
    x = jax.random.normal(kx, (B, N, C), dtype=jnp.float32)
    params = init_params(kp, C, H)
    y, size_out = inference_ltm_block(x, params, num_heads=H)
    jax.block_until_ready((y, size_out))
    print("KERNEL_OK")
</pallas_src>

<mosaic_0001>
module attributes {stable_mosaic.version = 11 : i64} {
  func.func @ln_linear_kernel(%arg0: i32, %arg1: memref<8x32xf32, #tpu.memory_space<vmem>>, %arg2: memref<1x32xf32, #tpu.memory_space<vmem>>, %arg3: memref<1x32xf32, #tpu.memory_space<vmem>>, %arg4: memref<32x96xbf16, #tpu.memory_space<vmem>>, %arg5: memref<8x96xbf16, #tpu.memory_space<vmem>>) attributes {dimension_semantics = [#tpu.dimension_semantics<parallel>], iteration_bounds = array<i64: 1>, scalar_prefetch = 0 : i64, scratch_operands = 0 : i64, tpu.core_type = #tpu.core_type<tc>, window_params = [{transform_indices = @transform_0, window_bounds = array<i64: 8, 32>}, {pipeline_mode = #tpu.pipeline_mode<synchronous>, transform_indices = @transform_1, window_bounds = array<i64: 1, 32>}, {pipeline_mode = #tpu.pipeline_mode<synchronous>, transform_indices = @transform_2, window_bounds = array<i64: 1, 32>}, {pipeline_mode = #tpu.pipeline_mode<synchronous>, transform_indices = @transform_3, window_bounds = array<i64: 32, 96>}, {transform_indices = @transform_4, window_bounds = array<i64: 8, 96>}]} {
    %c0 = arith.constant 0 : index
    %c0_0 = arith.constant 0 : index
    %0 = vector.load %arg1[%c0, %c0_0] : memref<8x32xf32, #tpu.memory_space<vmem>>, vector<8x32xf32>
    %c0_1 = arith.constant 0 : index
    %c0_2 = arith.constant 0 : index
    %1 = vector.load %arg2[%c0_1, %c0_2] : memref<1x32xf32, #tpu.memory_space<vmem>>, vector<1x32xf32>
    %c0_3 = arith.constant 0 : index
    %c0_4 = arith.constant 0 : index
    %2 = vector.load %arg3[%c0_3, %c0_4] : memref<1x32xf32, #tpu.memory_space<vmem>>, vector<1x32xf32>
    %cst = arith.constant dense<0.000000e+00> : vector<8xf32>
    %3 = vector.multi_reduction <add>, %0, %cst [1] : vector<8x32xf32> to vector<8xf32>
    %4 = vector.shape_cast %3 : vector<8xf32> to vector<8x1xf32>
    %cst_5 = arith.constant 3.200000e+01 : f32
    %5 = vector.broadcast %cst_5 : f32 to vector<8x1xf32>
    %6 = arith.divf %4, %5 : vector<8x1xf32>
    %7 = vector.broadcast %6 : vector<8x1xf32> to vector<8x32xf32>
    %8 = arith.subf %0, %7 : vector<8x32xf32>
    %9 = arith.mulf %8, %8 : vector<8x32xf32>
    %cst_6 = arith.constant dense<0.000000e+00> : vector<8xf32>
    %10 = vector.multi_reduction <add>, %9, %cst_6 [1] : vector<8x32xf32> to vector<8xf32>
    %11 = vector.shape_cast %10 : vector<8xf32> to vector<8x1xf32>
    %cst_7 = arith.constant 3.200000e+01 : f32
    %12 = vector.broadcast %cst_7 : f32 to vector<8x1xf32>
    %13 = arith.divf %11, %12 : vector<8x1xf32>
    %14 = vector.broadcast %6 : vector<8x1xf32> to vector<8x32xf32>
    %15 = arith.subf %0, %14 : vector<8x32xf32>
    %cst_8 = arith.constant 9.99999974E-6 : f32
    %16 = vector.broadcast %cst_8 : f32 to vector<8x1xf32>
    %17 = arith.addf %13, %16 : vector<8x1xf32>
    %18 = math.rsqrt %17 : vector<8x1xf32>
    %19 = vector.broadcast %18 : vector<8x1xf32> to vector<8x32xf32>
    %20 = arith.mulf %15, %19 : vector<8x32xf32>
    %21 = vector.broadcast %1 : vector<1x32xf32> to vector<8x32xf32>
    %22 = arith.mulf %20, %21 : vector<8x32xf32>
    %23 = vector.broadcast %2 : vector<1x32xf32> to vector<8x32xf32>
    %24 = arith.addf %22, %23 : vector<8x32xf32>
    %25 = arith.truncf %24 : vector<8x32xf32> to vector<8x32xbf16>
    %c0_9 = arith.constant 0 : index
    %c0_10 = arith.constant 0 : index
    %26 = vector.load %arg4[%c0_9, %c0_10] : memref<32x96xbf16, #tpu.memory_space<vmem>>, vector<32x96xbf16>
    %cst_11 = arith.constant dense<0.000000e+00> : vector<8x96xf32>
    %27 = tpu.matmul %25, %26, %cst_11 {dimension_numbers = #tpu.dot_dimension_numbers<[1], [0], [0], [1], [0, 0, 1, 1], [], []>} : vector<8x32xbf16>, vector<32x96xbf16>, vector<8x96xf32> -> vector<8x96xf32>
    %28 = arith.truncf %27 : vector<8x96xf32> to vector<8x96xbf16>
    %c0_12 = arith.constant 0 : index
    %c0_13 = arith.constant 0 : index
    %29 = vector.load %arg5[%c0_12, %c0_13] : memref<8x96xbf16, #tpu.memory_space<vmem>>, vector<8x96xbf16>
    tpu.vector_store %arg5[%c0_12, %c0_13], %28 {strides = array<i32>} : memref<8x96xbf16, #tpu.memory_space<vmem>>, vector<8x96xbf16>,
    return
  }
  func.func @transform_0(%arg0: i32) -> (i32, i32) {
    %c0_i32 = arith.constant 0 : i32
    %c0_i32_0 = arith.constant 0 : i32
    return %arg0, %c0_i32 : i32, i32
  }
  func.func @transform_1(%arg0: i32) -> (i32, i32) {
    %c0_i32 = arith.constant 0 : i32
    %c0_i32_0 = arith.constant 0 : i32
    %c0_i32_1 = arith.constant 0 : i32
    return %c0_i32, %c0_i32_0 : i32, i32
  }
  func.func @transform_2(%arg0: i32) -> (i32, i32) {
    %c0_i32 = arith.constant 0 : i32
    %c0_i32_0 = arith.constant 0 : i32
    %c0_i32_1 = arith.constant 0 : i32
    return %c0_i32, %c0_i32_0 : i32, i32
  }
  func.func @transform_3(%arg0: i32) -> (i32, i32) {
    %c0_i32 = arith.constant 0 : i32
    %c0_i32_0 = arith.constant 0 : i32
    %c0_i32_1 = arith.constant 0 : i32
    return %c0_i32, %c0_i32_0 : i32, i32
  }
  func.func @transform_4(%arg0: i32) -> (i32, i32) {
    %c0_i32 = arith.constant 0 : i32
    %c0_i32_0 = arith.constant 0 : i32
    return %arg0, %c0_i32 : i32, i32
  }
}

</mosaic_0001>

<bundles_post_ra>
// kernel: tpu_custom_call.1
= control target key start
LH: loop header
LB: loop body
LE: loop exit
PB: predicated region body
PF: predicated region fallthrough
CT: control target
= control target key end

     0   :  { %9 = vsyncpa [#allocation3], 0  ;;  %s299_s0 = inlined_call_operand.hbm [shape: f32[8,32], index: 0, kind: input, shape index: {}]   ;;  %s300_s1 = inlined_call_operand.vmem [shape: f32[1,32], index: 1, kind: input, shape index: {}]   ;;  %s301_s2 = inlined_call_operand.vmem [shape: f32[1,32], index: 2, kind: input, shape index: {}]   ;;  %s302_s3 = inlined_call_operand.hbm [shape: bf16[32,96], index: 3, kind: input, shape index: {}]   ;;  %s303_s4 = inlined_call_operand.hbm [shape: bf16[8,96], index: 4, kind: output, shape index: {}]  }
   0x1   :  { %10 = vsyncpa [#allocation6], 0 }
   0x2   :  { %11 = vsyncpa [#allocation4], 0  ;;  %s249_s15 = smov [#allocation2]   ;;  %s250_s17 = smov [#allocation5]  }
   0x3   :  { %s18_s16 = sshll.u32 %s249_s15, 4  ;;  %s31_s18 = sshll.u32 %s250_s17, 4  ;;  %s19_s16 = int_to_ptr.vmem [resolvable:$true] %s18_s16  ;;  %s32_s18 = int_to_ptr.vmem [resolvable:$true] %s31_s18 }
   0x4   :  { %s191_s19 = scalar_lea.vmem %s19_s16, 128  ;;  %p196_p1 = scmp.lt.s32.totalorder %s19_s16, %s19_s16 }
   0x5   :  { %p192_p0 = scmp.ne.s32.totalorder %s19_s16, %s191_s19  ;;  %p197_p2 = scmp.lt.s32.totalorder %s191_s19, %s191_s19 }
   0x7   :  { %p198_p3 = por %p197_p2, %p196_p1 }
   0x9   :  { %p199_p4 = pnand %p198_p3, %p192_p0 }
   0xb   :  { %202 = shalt.err (!%p199_p4)
}
   0xc   :  { %21 = dma.hbm_to_vmem [thread:$0]  %s299_s0, 128, %s19_s16, [#allocation3]  }
   0xd   :  { %s211_s22 = scalar_lea.vmem %s32_s18, 256  ;;  %p216_p6 = scmp.lt.s32.totalorder %s32_s18, %s32_s18 }
   0xe   :  { %p212_p5 = scmp.ne.s32.totalorder %s32_s18, %s211_s22  ;;  %p217_p7 = scmp.lt.s32.totalorder %s211_s22, %s211_s22 }
  0x10   :  { %p218_p8 = por %p217_p7, %p216_p6 }
  0x12   :  { %p219_p9 = pnand %p218_p8, %p212_p5 }
  0x14   :  { %222 = shalt.err (!%p219_p9)
}
  0x15   :  { %s251_s23 = smov 64   ;;  %s252_s24 = smov 4  }
  0x16   :  { %37 = dma.hbm_to_vmem [thread:$0]  %s302_s3, 256, %s32_s18, [#allocation6], %s251_s23, %s251_s23, %s252_s24  }
  0x17   :  { %243 = dma.done.wait [#allocation3], 128  }
  0x18   :  { %244 = vsyncadd [#allocation3], 4294967168 }
  0x19   :  { %245 = dma.done.wait [#allocation6], 256  }
  0x1a   :  { %246 = vsyncadd [#allocation6], 4294967040  ;;  %vm48_vm0 = vcmask 261120   ;;  %v45_v0 = vld [vmem:[#allocation2] sm:$0xff]  ;;  %v179_v7 = vld [vmem:[#allocation5 + $0x8] sm:$0xff]   ;;  %v253_v8 = vmov 0.0  }
  0x1b   :  { %v49_v1 = vsel %vm48_vm0, %v45_v0, 0.0  ;;  %164 = vmatprep.subr.bf16.mxu0 %v253_v8  ;;  %vm254_vm1 = vmmov 0   ;;  %v180_v9 = vld [vmem:[#allocation5] sm:$0xff]   ;;  %v156_v14 = vld [vmem:[%s300_s1] ss:$0 sm:$0xff]  ;;  %s255_s29 = smov [#allocation7]  }
  0x1c   :  { %50 = vadd.xlane.f32.xlu0 %v49_v1  ;;  %168 = vmatprep.mubr.msk.bf16.mxu0 %vm254_vm1, %v253_v8  ;;  %v157_v16 = vld [vmem:[%s301_s2] ss:$0 sm:$0xff]  ;;  %s146_s30 = sshll.u32 %s255_s29, 4  ;;  %vm138_vm2 = vcmask 781312   ;;  %s147_s30 = int_to_ptr.vmem [resolvable:$true] %s146_s30 }
  0x1d   :  { %165 = vmatpush3.bf16.msra.mxu0 %v179_v7  ;;  %s223_s1 = scalar_lea.vmem %s147_s30, 64  ;;  %p228_p11 = scmp.lt.s32.totalorder %s147_s30, %s147_s30 }
  0x1e   :  { %166 = vmatprep.subr.bf16.mxu0 %v253_v8  ;;  %p224_p10 = scmp.ne.s32.totalorder %s147_s30, %s223_s1  ;;  %p229_p12 = scmp.lt.s32.totalorder %s223_s1, %s223_s1 }
  0x20   :  { %p230_p13 = por %p229_p12, %p228_p11 }
  0x21   :  { %167 = vmatpush3.bf16.msra.mxu0 %v180_v9 }
  0x22   :  { %p231_p0 = pnand %p230_p13, %p224_p10 }
  0xa5   :  { %v51_v2 = vpop.xlane.xlu0 %50 }
  0xa6   :  { %v53_v3 = vmul.f32 0.03125, %v51_v2 }
  0xa8   :  { %v54_v4 = vsub.f32 %v45_v0, %v53_v3 }
  0xaa   :  { %v55_v5 = vmul.f32 %v54_v4, %v54_v4 }
  0xac   :  { %v56_v6 = vsel %vm48_vm0, %v55_v5, 0.0 }
  0xad   :  { %57 = vadd.xlane.f32.xlu0 %v56_v6 }
 0x136   :  { %v58_v10 = vpop.xlane.xlu0 %57 }
 0x137   :  { %v59_v11 = vmul.f32 0.03125, %v58_v10 }
 0x139   :  { %v60_v12 = vadd.f32 1e-05, %v59_v11 }
 0x13b   :  { %181 = vrsqrt.f32 %v60_v12 }
 0x148   :  { %v182_v13 = vpop.eup %181 }
 0x149   :  { %v62_v15 = vmul.f32 %v182_v13, %v54_v4 }
 0x14b   :  { %v69_v17 = vmul.f32 %v156_v14, %v62_v15 }
 0x14d   :  { %v76_v18 = vadd.f32 %v157_v16, %v69_v17 }
 0x14f   :  { %v77_v19 = vpack.c.bf16 %v76_v18, %v76_v18 }
 0x151   :  { %169 = vmatmul.mubr.msk.bf16.vlgmr.msra.gmra.mxu0 %vm48_vm0, %v77_v19 }
 0x211   :  { %v131_v20 = vpop.f32.mrf.mxu0 }
 0x212   :  { %v137_v21 = vpack.c.bf16 %v131_v20, %v131_v20 }
 0x213   :  { %v170_v22 = vpop.f32.mrf.mxu0 }
 0x214   :  { %139 = vst.msk [vmem:[#allocation7] sm:$0xf] %vm138_vm2, %v137_v21 }
 0x215   :  { %v134_v23 = vpop.f32.mrf.mxu0 }
 0x216   :  { %234 = shalt.err (!%p231_p0)
}
 0x217   :  { %149 = dma.vmem_to_hbm [thread:$0]  %s147_s30, 64, %s303_s4, [#allocation4]   ;;  %v171_v24 = vpop.f32.mrf.mxu0 }
 0x218   :  { %247 = dma.done.wait [#allocation4], 64  }
 0x219   :  { %248 = vsyncadd [#allocation4], 4294967232 }
 0x21a   :  { %153 = vsyncpa [#allocation3], 1 }
 0x21b   :  { %154 = vsyncpa [#allocation6], 1 }
 0x21c   :  { %155 = vsyncpa [#allocation4], 1 }

</bundles_post_ra>
